<compile_context>
chip_gen: v6e
topology: v6e:2x2x1
jax: 0.10.0
libtpu: 0.0.40
codegen_flags: <defaults>
</compile_context>

<pallas_src>
import jax
import jax.numpy as jnp
from jax.experimental import pallas as pl
from jax.experimental.pallas import tpu as pltpu

_HIDDEN = 256
_TARGET_TB = 2048  # batch tile target; VMEM cost stays < ~1 MiB even at 4096


def _round_up(x, m):
    return (x + m - 1) // m * m


def _mlp_kernel(x_ref, w1_ref, b1_ref, w2_ref, b2_ref, o_ref):
    # layer1: (tb, F_in)bf16 @ (F_in, 256)bf16 -> f32 accumulate on the MXU
    h = jnp.dot(x_ref[...], w1_ref[...], preferred_element_type=jnp.float32)
    # bias + ReLU in f32 (VPU-native on all generations)
    h = jnp.maximum(h + b1_ref[...], 0.0)
    # layer2: cast activation to bf16 for the MXU, accumulate in f32
    out = jnp.dot(h.astype(w2_ref.dtype), w2_ref[...],
                  preferred_element_type=jnp.float32)
    o_ref[...] = (out + b2_ref[...]).astype(o_ref.dtype)


def prepare_params(params):
    """One-time param prep: bf16 weights for the MXU, f32 biases for the epilogue.

    Call once (e.g. at init / after loading weights) and reuse the result for
    every forward call so the casts are not redone per call.
    """
    w1, b1, w2, b2 = params  # w1:(F_in,256) b1:(1,256) w2:(256,F_out) b2:(1,F_out)
    return (w1.astype(jnp.bfloat16), b1.astype(jnp.float32),
            w2.astype(jnp.bfloat16), b2.astype(jnp.float32))


def network_forward(x, prepared_params, n_zernike, n_directions, n_layers_DMs,
                    batch_size):
    """Forward pass equivalent to the PyTorch `network` module.

    x: (batch_size, n_zernike, n_directions) float32
    prepared_params: output of prepare_params()
    returns: (batch_size, n_layers_DMs, n_zernike) float32
    """
    w1_b, b1_f, w2_b, b2_f = prepared_params
    f_in = n_zernike * n_directions
    f_out = n_zernike * n_layers_DMs
    hidden = _HIDDEN

    # Batch padded only to the sublane multiple (8) — never to a full tile.
    b_pad = _round_up(batch_size, 8)

    # Tile selection: big tiles to amortize the ~0.35us/step overhead, but
    # guarantee grid >= 2 when the batch allows so v7x's two TensorCores both
    # get work (parallel dimension semantics).
    if b_pad >= 16:
        tb = min(_TARGET_TB, _round_up(pl.cdiv(b_pad, 2), 8))
    else:
        tb = b_pad
    grid = (pl.cdiv(b_pad, tb),)

    # torch .view(batch, -1), cast to bf16 MXU input; pad batch rows w/ zeros.
    x_flat = x.reshape(batch_size, f_in).astype(jnp.bfloat16)
    if b_pad != batch_size:
        x_flat = jnp.pad(x_flat, ((0, b_pad - batch_size), (0, 0)))

    out_p = pl.pallas_call(
        _mlp_kernel,
        out_shape=jax.ShapeDtypeStruct((b_pad, f_out), jnp.float32),
        grid=grid,
        in_specs=[
            pl.BlockSpec((tb, f_in), lambda i: (i, 0)),      # x: tiled on batch
            pl.BlockSpec((f_in, hidden), lambda i: (0, 0)),  # W1: VMEM-resident
            pl.BlockSpec((1, hidden), lambda i: (0, 0)),     # b1: resident
            pl.BlockSpec((hidden, f_out), lambda i: (0, 0)), # W2: resident
            pl.BlockSpec((1, f_out), lambda i: (0, 0)),      # b2: resident
        ],
        out_specs=pl.BlockSpec((tb, f_out), lambda i: (i, 0)),
        compiler_params=pltpu.CompilerParams(
            dimension_semantics=("parallel",)),
    )(x_flat, w1_b, b1_f, w2_b, b2_f)

    out = out_p[:batch_size]
    return out.reshape(batch_size, n_layers_DMs, n_zernike)


def init_params(key, n_zernike, n_directions, n_layers_DMs):
    """Deterministic init mimicking nn.Linear default (U[-1/sqrt(fan_in), 1/sqrt(fan_in)]).

    Weight layout is (in_features, out_features), i.e. transposed w.r.t.
    nn.Linear.weight; the final .view matches torch's row-major reshape of the
    out_features axis.
    """
    f_in = n_zernike * n_directions
    hidden = _HIDDEN
    f_out = n_zernike * n_layers_DMs
    k1, k2, k3, k4 = jax.random.split(key, 4)

    bound1 = 1.0 / jnp.sqrt(f_in)
    w1 = jax.random.uniform(k1, (f_in, hidden), jnp.float32, -bound1, bound1)
    b1 = jax.random.uniform(k2, (1, hidden), jnp.float32, -bound1, bound1)

    bound2 = 1.0 / jnp.sqrt(hidden)
    w2 = jax.random.uniform(k3, (hidden, f_out), jnp.float32, -bound2, bound2)
    b2 = jax.random.uniform(k4, (1, f_out), jnp.float32, -bound2, bound2)
    return (w1, b1, w2, b2)


if __name__ == "__main__":
    # Small shapes consistent with the module's forward.
    n_zernike = 8
    n_directions = 4
    n_layers_DMs = 2
    batch_size = 2

    key = jax.random.PRNGKey(0)
    kx, kp = jax.random.split(key)

    x = jax.random.normal(kx, (batch_size, n_zernike, n_directions), jnp.float32)
    params = init_params(kp, n_zernike, n_directions, n_layers_DMs)
    prepared = prepare_params(params)   # one-time weight prep (cached)

    out = network_forward(x, prepared, n_zernike, n_directions, n_layers_DMs,
                          batch_size)
    out = jax.block_until_ready(out)
    assert out.shape == (batch_size, n_layers_DMs, n_zernike)

    # Reference in plain JAX using the same bf16-input / f32-accumulate math
    # as the kernel (matches the torch module up to bf16 weight/input cast).
    w1, b1, w2, b2 = params
    xb = x.reshape(batch_size, -1).astype(jnp.bfloat16)
    h = jnp.dot(xb, w1.astype(jnp.bfloat16),
                preferred_element_type=jnp.float32) + b1
    h = jnp.maximum(h, 0.0)
    ref = jnp.dot(h.astype(jnp.bfloat16), w2.astype(jnp.bfloat16),
                  preferred_element_type=jnp.float32) + b2
    ref = ref.reshape(batch_size, n_layers_DMs, n_zernike)
    assert jnp.allclose(out, ref, atol=1e-3, rtol=1e-3)

    # Loose sanity check against full-f32 math (bf16 cast error only).
    ref_f32 = (jnp.maximum(x.reshape(batch_size, -1) @ w1 + b1, 0.0) @ w2 + b2
               ).reshape(batch_size, n_layers_DMs, n_zernike)
    assert jnp.allclose(out, ref_f32, atol=5e-2, rtol=5e-2)

    print("KERNEL_OK")
</pallas_src>

<mosaic_0001>
module attributes {stable_mosaic.version = 11 : i64} {
  func.func @_mlp_kernel(%arg0: i32, %arg1: memref<8x32xbf16, #tpu.memory_space<vmem>>, %arg2: memref<32x256xbf16, #tpu.memory_space<vmem>>, %arg3: memref<1x256xf32, #tpu.memory_space<vmem>>, %arg4: memref<256x16xbf16, #tpu.memory_space<vmem>>, %arg5: memref<1x16xf32, #tpu.memory_space<vmem>>, %arg6: memref<8x16xf32, #tpu.memory_space<vmem>>) attributes {dimension_semantics = [#tpu.dimension_semantics<parallel>], iteration_bounds = array<i64: 1>, scalar_prefetch = 0 : i64, scratch_operands = 0 : i64, tpu.core_type = #tpu.core_type<tc>, window_params = [{transform_indices = @transform_0, window_bounds = array<i64: 8, 32>}, {pipeline_mode = #tpu.pipeline_mode<synchronous>, transform_indices = @transform_1, window_bounds = array<i64: 32, 256>}, {pipeline_mode = #tpu.pipeline_mode<synchronous>, transform_indices = @transform_2, window_bounds = array<i64: 1, 256>}, {pipeline_mode = #tpu.pipeline_mode<synchronous>, transform_indices = @transform_3, window_bounds = array<i64: 256, 16>}, {pipeline_mode = #tpu.pipeline_mode<synchronous>, transform_indices = @transform_4, window_bounds = array<i64: 1, 16>}, {transform_indices = @transform_5, window_bounds = array<i64: 8, 16>}]} {
    %c0 = arith.constant 0 : index
    %c0_0 = arith.constant 0 : index
    %0 = vector.load %arg1[%c0, %c0_0] : memref<8x32xbf16, #tpu.memory_space<vmem>>, vector<8x32xbf16>
    %c0_1 = arith.constant 0 : index
    %c0_2 = arith.constant 0 : index
    %1 = vector.load %arg2[%c0_1, %c0_2] : memref<32x256xbf16, #tpu.memory_space<vmem>>, vector<32x256xbf16>
    %cst = arith.constant dense<0.000000e+00> : vector<8x256xf32>
    %2 = tpu.matmul %0, %1, %cst {dimension_numbers = #tpu.dot_dimension_numbers<[1], [0], [0], [1], [0, 0, 1, 1], [], []>} : vector<8x32xbf16>, vector<32x256xbf16>, vector<8x256xf32> -> vector<8x256xf32>
    %c0_3 = arith.constant 0 : index
    %c0_4 = arith.constant 0 : index
    %3 = vector.load %arg3[%c0_3, %c0_4] : memref<1x256xf32, #tpu.memory_space<vmem>>, vector<1x256xf32>
    %4 = vector.broadcast %3 : vector<1x256xf32> to vector<8x256xf32>
    %5 = arith.addf %2, %4 : vector<8x256xf32>
    %cst_5 = arith.constant 0.000000e+00 : f32
    %6 = vector.broadcast %cst_5 : f32 to vector<8x256xf32>
    %7 = arith.maximumf %5, %6 : vector<8x256xf32>
    %8 = arith.truncf %7 : vector<8x256xf32> to vector<8x256xbf16>
    %c0_6 = arith.constant 0 : index
    %c0_7 = arith.constant 0 : index
    %9 = vector.load %arg4[%c0_6, %c0_7] : memref<256x16xbf16, #tpu.memory_space<vmem>>, vector<256x16xbf16>
    %cst_8 = arith.constant dense<0.000000e+00> : vector<8x16xf32>
    %10 = tpu.matmul %8, %9, %cst_8 {dimension_numbers = #tpu.dot_dimension_numbers<[1], [0], [0], [1], [0, 0, 1, 1], [], []>} : vector<8x256xbf16>, vector<256x16xbf16>, vector<8x16xf32> -> vector<8x16xf32>
    %c0_9 = arith.constant 0 : index
    %c0_10 = arith.constant 0 : index
    %11 = vector.load %arg5[%c0_9, %c0_10] : memref<1x16xf32, #tpu.memory_space<vmem>>, vector<1x16xf32>
    %12 = vector.broadcast %11 : vector<1x16xf32> to vector<8x16xf32>
    %13 = arith.addf %10, %12 : vector<8x16xf32>
    %c0_11 = arith.constant 0 : index
    %c0_12 = arith.constant 0 : index
    %14 = vector.load %arg6[%c0_11, %c0_12] : memref<8x16xf32, #tpu.memory_space<vmem>>, vector<8x16xf32>
    tpu.vector_store %arg6[%c0_11, %c0_12], %13 {strides = array<i32>} : memref<8x16xf32, #tpu.memory_space<vmem>>, vector<8x16xf32>,
    return
  }
  func.func @transform_0(%arg0: i32) -> (i32, i32) {
    %c0_i32 = arith.constant 0 : i32
    %c0_i32_0 = arith.constant 0 : i32
    return %arg0, %c0_i32 : i32, i32
  }
  func.func @transform_1(%arg0: i32) -> (i32, i32) {
    %c0_i32 = arith.constant 0 : i32
    %c0_i32_0 = arith.constant 0 : i32
    %c0_i32_1 = arith.constant 0 : i32
    return %c0_i32, %c0_i32_0 : i32, i32
  }
  func.func @transform_2(%arg0: i32) -> (i32, i32) {
    %c0_i32 = arith.constant 0 : i32
    %c0_i32_0 = arith.constant 0 : i32
    %c0_i32_1 = arith.constant 0 : i32
    return %c0_i32, %c0_i32_0 : i32, i32
  }
  func.func @transform_3(%arg0: i32) -> (i32, i32) {
    %c0_i32 = arith.constant 0 : i32
    %c0_i32_0 = arith.constant 0 : i32
    %c0_i32_1 = arith.constant 0 : i32
    return %c0_i32, %c0_i32_0 : i32, i32
  }
  func.func @transform_4(%arg0: i32) -> (i32, i32) {
    %c0_i32 = arith.constant 0 : i32
    %c0_i32_0 = arith.constant 0 : i32
    %c0_i32_1 = arith.constant 0 : i32
    return %c0_i32, %c0_i32_0 : i32, i32
  }
  func.func @transform_5(%arg0: i32) -> (i32, i32) {
    %c0_i32 = arith.constant 0 : i32
    %c0_i32_0 = arith.constant 0 : i32
    return %arg0, %c0_i32 : i32, i32
  }
}

</mosaic_0001>

<bundles_post_ra>
// kernel: tpu_custom_call.1
= control target key start
LH: loop header
LB: loop body
LE: loop exit
PB: predicated region body
PF: predicated region fallthrough
CT: control target
= control target key end

     0   :  { %v389_v2 = vmov 0   ;;  %vm59_vm0 = vcmask 261120   ;;  %s493_s0 = inlined_call_operand.vmem [shape: bf16[8,32], index: 0, kind: input, shape index: {}]   ;;  %s494_s1 = inlined_call_operand.vmem [shape: bf16[32,256], index: 1, kind: input, shape index: {}]   ;;  %s495_s2 = inlined_call_operand.vmem [shape: f32[1,256], index: 2, kind: input, shape index: {}]   ;;  %s496_s3 = inlined_call_operand.vmem [shape: bf16[256,16], index: 3, kind: input, shape index: {}]   ;;  %s497_s4 = inlined_call_operand.vmem [shape: f32[1,16], index: 4, kind: input, shape index: {}]   ;;  %s498_s5 = inlined_call_operand.hbm [shape: f32[8,16], index: 5, kind: output, shape index: {}]  }
   0x1   :  { %v345_v0 = vld [vmem:[%s494_s1 + $0x14] ss:$8 sps:$4 sm:$0xff]   ;;  %v347_v1 = vld [vmem:[%s494_s1 + $0x10] ss:$8 sps:$4 sm:$0xff]   ;;  %95 = vmatprep.mubr.bf16.mxu0 %v389_v2  ;;  %v348_v3 = vld [vmem:[%s494_s1 + $0x4] ss:$8 sps:$4 sm:$0xff]  }
   0x2   :  { %75 = vmatprep.subr.bf16.mxu0 %v345_v0  ;;  %v350_v4 = vld [vmem:[%s494_s1] ss:$8 sps:$4 sm:$0xff]   ;;  %v351_v5 = vld [vmem:[%s496_s3 + $0x78] sm:$0xff]   ;;  %v353_v8 = vld [vmem:[%s496_s3 + $0x70] sm:$0xff]  }
   0x3   :  { %76 = vmatpush1.bf16.msra.mxu0 %v347_v1  ;;  %v352_v6 = vld [vmem:[%s496_s3 + $0x38] sm:$0xff]   ;;  %v22_v7 = vld [vmem:[%s493_s0] sm:$0xf]  ;;  %321 = vmatprep.subr.bf16.mxu1 %v351_v5  ;;  %v354_v9 = vld [vmem:[%s496_s3 + $0x30] sm:$0xff]  }
   0x4   :  { %77 = vmatprep.subr.bf16.mxu0 %v348_v3  ;;  %322 = vmatpush3.bf16.msra.mxu1 %v352_v6  ;;  %v355_v10 = vld [vmem:[%s496_s3 + $0x68] sm:$0xff]   ;;  %v357_v12 = vld [vmem:[%s496_s3 + $0x60] sm:$0xff]   ;;  %v359_v14 = vld [vmem:[%s496_s3 + $0x58] sm:$0xff]  }
   0x5   :  { %323 = vmatprep.subr.bf16.mxu1 %v353_v8  ;;  %v356_v11 = vld [vmem:[%s496_s3 + $0x28] sm:$0xff]   ;;  %v358_v13 = vld [vmem:[%s496_s3 + $0x20] sm:$0xff]   ;;  %v360_v15 = vld [vmem:[%s496_s3 + $0x18] sm:$0xff]  }
   0x7   :  { %78 = vmatpush1.bf16.msra.mxu0 %v350_v4 }
   0x8   :  { %324 = vmatpush3.bf16.msra.mxu1 %v354_v9 }
   0x9   :  { %325 = vmatprep.subr.bf16.mxu1 %v355_v10 }
   0xa   :  { %303 = vmatmul.mubr.msk.bf16.vlgmr.msra.gmra.mxu0 %vm59_vm0, %v22_v7 }
   0xc   :  { %326 = vmatpush3.bf16.msra.mxu1 %v356_v11 }
   0xd   :  { %327 = vmatprep.subr.bf16.mxu1 %v357_v12 }
  0x10   :  { %328 = vmatpush3.bf16.msra.mxu1 %v358_v13 }
  0x11   :  { %10 = vsyncpa [#allocation3], 0  ;;  %329 = vmatprep.subr.bf16.mxu1 %v359_v14  ;;  %v361_v16 = vld [vmem:[%s496_s3 + $0x50] sm:$0xff]   ;;  %v363_v18 = vld [vmem:[%s496_s3 + $0x48] sm:$0xff]   ;;  %v29_v22 = vlaneseq  ;;  %vm283_vm1 = vcmask 130048  }
  0x12   :  { %v362_v17 = vld [vmem:[%s496_s3 + $0x10] sm:$0xff]   ;;  %v364_v19 = vld [vmem:[%s496_s3 + $0x8] sm:$0xff]   ;;  %v365_v20 = vld [vmem:[%s496_s3 + $0x40] sm:$0xff]  }
  0x13   :  { %v366_v21 = vld [vmem:[%s496_s3] sm:$0xff]   ;;  %v30_v23 = vshrl.u32 %v29_v22, 7 }
  0x14   :  { %330 = vmatpush3.bf16.msra.mxu1 %v360_v15  ;;  %v27_v25 = vld [vmem:[%s495_s2] sm:$0x3]  ;;  %s390_s2 = smov [#allocation2]  }
  0x15   :  { %331 = vmatprep.subr.bf16.mxu1 %v361_v16  ;;  %v31_v24 = vsub.s32 0, %v30_v23  ;;  %v35_v26 = vsub.s32 1, %v30_v23  ;;  %v304_v40 = vld [vmem:[%s497_s4] ss:$0 sm:$0xff]  ;;  %s291_s10 = sshll.u32 %s390_s2, 4  ;;  %s292_s10 = int_to_ptr.vmem [resolvable:$true] %s291_s10 }
  0x16   :  { %s367_s11 = scalar_lea.vmem %s292_s10, 128  ;;  %p372_p1 = scmp.lt.s32.totalorder %s292_s10, %s292_s10 }
  0x17   :  { %v32_v27 = vrot.slane %v27_v25, %v31_v24  ;;  %v36_v28 = vrot.slane %v27_v25, %v35_v26  ;;  %p368_p0 = scmp.ne.s32.totalorder %s292_s10, %s367_s11  ;;  %p373_p2 = scmp.lt.s32.totalorder %s367_s11, %s367_s11 }
  0x18   :  { %332 = vmatpush3.bf16.msra.mxu1 %v362_v17 }
  0x19   :  { %333 = vmatprep.subr.bf16.mxu1 %v363_v18  ;;  %p374_p3 = por %p373_p2, %p372_p1 }
  0x1b   :  { %p375_p4 = pnand %p374_p3, %p368_p0 }
  0x1c   :  { %334 = vmatpush3.bf16.msra.mxu1 %v364_v19 }
  0x1d   :  { %335 = vmatprep.subr.bf16.mxu1 %v365_v20 }
  0x20   :  { %336 = vmatpush3.bf16.msra.mxu1 %v366_v21 }
  0xca   :  { %v97_v29 = vpop.f32.mrf.mxu0 }
  0xcb   :  { %v98_v30 = vadd.f32 %v97_v29, %v32_v27 }
  0xcc   :  { %v99_v31 = vpop.f32.mrf.mxu0 }
  0xcd   :  { %v100_v32 = vadd.f32 %v99_v31, %v36_v28  ;;  %v104_v33 = vmax.f32 %v98_v30, 0.0 }
  0xce   :  { %v101_v34 = vpop.f32.mrf.mxu0 }
  0xcf   :  { %v105_v35 = vmax.f32 %v100_v32, 0.0  ;;  %v106_v38 = vpack.c.bf16 %v104_v33, %v104_v33 }
  0xd0   :  { %v102_v36 = vpop.f32.mrf.mxu0 }
  0xd1   :  { %v107_v37 = vpack.c.bf16 %v105_v35, %v105_v35 }
  0xd3   :  { %275 = vmatprep.mubr.bf16.mxu1 %v107_v37 }
  0xd4   :  { %276 = vmatmul.mubr.bf16.vlgmr.msra.gmra.mxu1 %v106_v38 }
 0x194   :  { %v337_v39 = vpop.f32.mrf.mxu1 }
 0x196   :  { %v338_v41 = vpop.f32.mrf.mxu1 }
 0x197   :  { %v339_v42 = vadd.f32 %v338_v41, %v337_v39 }
 0x198   :  { %v340_v43 = vpop.f32.mrf.mxu1 }
 0x199   :  { %v278_v44 = vadd.f32 %v339_v42, %v304_v40 }
 0x19a   :  { %v341_v45 = vpop.f32.mrf.mxu1 }
 0x19b   :  { %284 = vst.msk [vmem:[#allocation2] sm:$0xff] %vm283_vm1, %v278_v44 }
 0x19c   :  { %378 = shalt.err (!%p375_p4)
}
 0x19d   :  { %294 = dma.vmem_to_hbm [thread:$0]  %s292_s10, 128, %s498_s5, [#allocation3]  }
 0x19e   :  { %387 = dma.done.wait [#allocation3], 128  }
 0x19f   :  { %388 = vsyncadd [#allocation3], 4294967168 }
 0x1a0   :  { %298 = vsyncpa [#allocation3], 1 }

</bundles_post_ra>
